<compile_context>
chip_gen: v6e
topology: v6e:2x2x1
jax: 0.10.0
libtpu: 0.0.40
codegen_flags: <defaults>
</compile_context>

<pallas_src>
import math
from typing import NamedTuple

import jax
import jax.numpy as jnp
from jax.experimental import pallas as pl
from jax.experimental.pallas import tpu as pltpu

_PACK = 8  # 8 f32 batch rows -> one dense row; 8 * N = 128 lanes when N = 16


class EncoderParams(NamedTuple):
    weight_kn: jax.Array      # (K, N)  == W.T of PyTorch nn.Linear
    bias: jax.Array           # (1, N)
    weight_dense: jax.Array   # (_PACK*K, _PACK*N) block-diagonal copy of weight_kn
    bias_dense: jax.Array     # (1, _PACK*N)


def _densify(weight_kn, bias_1n):
    """Build the lane-dense (block-diagonal) weight / tiled bias. Done once."""
    k, n = weight_kn.shape
    eye = jnp.eye(_PACK, dtype=weight_kn.dtype)
    # block (j, j) == weight_kn, zeros elsewhere  -> (_PACK*k, _PACK*n)
    w_dense = (eye[:, None, :, None] * weight_kn[None, :, None, :]).reshape(
        _PACK * k, _PACK * n)
    b_dense = jnp.tile(bias_1n, (1, _PACK))
    return w_dense, b_dense


def make_params(weight_kn, bias):
    weight_kn = jnp.asarray(weight_kn, jnp.float32)
    bias_1n = jnp.asarray(bias, jnp.float32).reshape(1, -1)
    w_dense, b_dense = _densify(weight_kn, bias_1n)
    return EncoderParams(weight_kn, bias_1n, w_dense, b_dense)


def init_params(key, input_size, encoded_size):
    """Xavier-uniform weight, zero bias (matches the PyTorch init)."""
    assert input_size >= encoded_size, (
        f"input_size must be >= encoded_size, got {input_size} < {encoded_size}")
    limit = math.sqrt(6.0 / (input_size + encoded_size))
    weight_kn = jax.random.uniform(
        key, (input_size, encoded_size), jnp.float32, -limit, limit)
    bias = jnp.zeros((encoded_size,), jnp.float32)
    return make_params(weight_kn, bias)


def from_torch_linear_params(weight_oi, bias_o):
    """One-time conversion from PyTorch nn.Linear layout (out, in) / (out,)."""
    return make_params(jnp.asarray(weight_oi).T, jnp.asarray(bias_o))


def _dense_linear_kernel(x_ref, w_ref, b_ref, o_ref):
    # x_ref: (tm8, 8K) f32, w_ref: (8K, 8N) f32 block-diag, b_ref: (1, 8N),
    # o_ref: (tm8, 8N).  Lane-dense loads and stores; f32 MXU accumulation.
    acc = jnp.dot(x_ref[...], w_ref[...], preferred_element_type=jnp.float32)
    o_ref[...] = (acc + b_ref[...]).astype(o_ref.dtype)


def _round_up(a, m):
    return ((a + m - 1) // m) * m


def small_vector_state_encoder(x, params, *, block_b=4096,
                               min_pallas_batch=64, return_stats=False):
    """Forward pass of SmallVectorStateEncoder: y = x @ W.T + b."""
    x = jnp.asarray(x)
    if x.ndim == 1:                  # make_it_batched_torch_tensor behavior
        x = x[None, :]
    B, K = x.shape
    Kp, N = params.weight_kn.shape
    assert K == Kp, f"input_size mismatch: x has {K}, weight has {Kp}"

    if B < min_pallas_batch:
        # Tiny batches (module-typical B=2): pallas_call launch + DMA fixed
        # cost is ~100% of runtime; let XLA fuse the tiny matmul instead.
        y = jnp.dot(x, params.weight_kn,
                    precision=jax.lax.Precision.HIGHEST) + params.bias
        return (y, {}) if return_stats else y

    # ---------------- lane-dense Pallas path ----------------
    pad = (-B) % _PACK
    xp = jnp.pad(x, ((0, pad), (0, 0))) if pad else x
    b8 = (B + pad) // _PACK          # dense rows (8 batch rows each)
    kd = _PACK * K                   # 256 when K=32 -> dense vlds
    nd = _PACK * N                   # 128 when N=16 -> unmasked vsts
    x_dense = xp.reshape(b8, kd)     # contiguous row-major repack

    # Tile as big as block_b allows, but split into >= 2 roughly equal grid
    # steps so the "parallel" batch axis shards across v7x's two TensorCores.
    block_b8 = max(_PACK, block_b // _PACK)
    tm8 = min(block_b8, _round_up(pl.cdiv(b8, 2), _PACK))
    grid = (pl.cdiv(b8, tm8),)

    cost = pl.CostEstimate(
        flops=2 * b8 * kd * nd,
        transcendentals=0,
        bytes_accessed=4 * (b8 * kd + kd * nd + nd + b8 * nd),
    )

    out_dense = pl.pallas_call(
        _dense_linear_kernel,
        out_shape=jax.ShapeDtypeStruct((b8, nd), x.dtype),
        grid=grid,
        in_specs=[
            pl.BlockSpec((tm8, kd), lambda i: (i, 0)),  # x: streamed over batch
            pl.BlockSpec((kd, nd), lambda i: (0, 0)),   # weight: VMEM-resident
            pl.BlockSpec((1, nd), lambda i: (0, 0)),    # bias:   VMEM-resident
        ],
        out_specs=pl.BlockSpec((tm8, nd), lambda i: (i, 0)),
        compiler_params=pltpu.CompilerParams(
            dimension_semantics=("parallel",),  # no-op on v5e/v6e; 2 TCs on v7x
        ),
        cost_estimate=cost,
    )(x_dense, params.weight_dense, params.bias_dense)

    y = out_dense.reshape(B + pad, N)
    y = y[:B] if pad else y
    return (y, {}) if return_stats else y


def _reference(x, params):
    return jnp.dot(x, params.weight_kn,
                   precision=jax.lax.Precision.HIGHEST) + params.bias


if __name__ == "__main__":
    key = jax.random.PRNGKey(0)
    k_w, k_x0, k_x1, k_x2 = jax.random.split(key, 4)

    input_size, encoded_size = 32, 16   # small, module-typical shapes
    params = init_params(k_w, input_size, encoded_size)

    # 1) Module-typical tiny batch (B=2): plain-XLA fallback path.
    x_small = jax.random.normal(k_x0, (2, input_size), jnp.float32)
    y_small = jax.block_until_ready(small_vector_state_encoder(x_small, params))
    assert y_small.shape == (2, encoded_size)
    assert jnp.allclose(y_small, _reference(x_small, params), atol=1e-4, rtol=1e-4)

    # 2) Large batch: lane-dense Pallas path, grid of 2 (both v7x TCs busy).
    x_big = jax.random.normal(k_x1, (1024, input_size), jnp.float32)
    y_big = jax.block_until_ready(small_vector_state_encoder(x_big, params))
    assert y_big.shape == (1024, encoded_size)
    assert jnp.allclose(y_big, _reference(x_big, params), atol=1e-4, rtol=1e-4)

    # 3) Ragged batch: exercises row padding (100 -> 104) and a partial last
    #    grid block (masked writeback of out-of-range rows).
    x_rag = jax.random.normal(k_x2, (100, input_size), jnp.float32)
    y_rag = jax.block_until_ready(small_vector_state_encoder(x_rag, params))
    assert y_rag.shape == (100, encoded_size)
    assert jnp.allclose(y_rag, _reference(x_rag, params), atol=1e-4, rtol=1e-4)

    print("KERNEL_OK")
</pallas_src>

<mosaic_0001>
module attributes {stable_mosaic.version = 11 : i64} {
  func.func @_dense_linear_kernel(%arg0: i32, %arg1: memref<64x256xf32, #tpu.memory_space<vmem>>, %arg2: memref<256x128xf32, #tpu.memory_space<vmem>>, %arg3: memref<1x128xf32, #tpu.memory_space<vmem>>, %arg4: memref<64x128xf32, #tpu.memory_space<vmem>>) attributes {dimension_semantics = [#tpu.dimension_semantics<parallel>], iteration_bounds = array<i64: 2>, scalar_prefetch = 0 : i64, scratch_operands = 0 : i64, tpu.core_type = #tpu.core_type<tc>, window_params = [{transform_indices = @transform_0, window_bounds = array<i64: 64, 256>}, {pipeline_mode = #tpu.pipeline_mode<synchronous>, transform_indices = @transform_1, window_bounds = array<i64: 256, 128>}, {pipeline_mode = #tpu.pipeline_mode<synchronous>, transform_indices = @transform_2, window_bounds = array<i64: 1, 128>}, {transform_indices = @transform_3, window_bounds = array<i64: 64, 128>}]} {
    %c0 = arith.constant 0 : index
    %c0_0 = arith.constant 0 : index
    %0 = vector.load %arg1[%c0, %c0_0] : memref<64x256xf32, #tpu.memory_space<vmem>>, vector<64x256xf32>
    %c0_1 = arith.constant 0 : index
    %c0_2 = arith.constant 0 : index
    %1 = vector.load %arg2[%c0_1, %c0_2] : memref<256x128xf32, #tpu.memory_space<vmem>>, vector<256x128xf32>
    %cst = arith.constant dense<0.000000e+00> : vector<64x128xf32>
    %2 = tpu.matmul %0, %1, %cst {dimension_numbers = #tpu.dot_dimension_numbers<[1], [0], [0], [1], [0, 0, 1, 1], [], []>} : vector<64x256xf32>, vector<256x128xf32>, vector<64x128xf32> -> vector<64x128xf32>
    %c0_3 = arith.constant 0 : index
    %c0_4 = arith.constant 0 : index
    %3 = vector.load %arg3[%c0_3, %c0_4] : memref<1x128xf32, #tpu.memory_space<vmem>>, vector<1x128xf32>
    %4 = vector.broadcast %3 : vector<1x128xf32> to vector<64x128xf32>
    %5 = arith.addf %2, %4 : vector<64x128xf32>
    %c0_5 = arith.constant 0 : index
    %c0_6 = arith.constant 0 : index
    %6 = vector.load %arg4[%c0_5, %c0_6] : memref<64x128xf32, #tpu.memory_space<vmem>>, vector<64x128xf32>
    tpu.vector_store %arg4[%c0_5, %c0_6], %5 {strides = array<i32>} : memref<64x128xf32, #tpu.memory_space<vmem>>, vector<64x128xf32>,
    return
  }
  func.func @transform_0(%arg0: i32) -> (i32, i32) {
    %c0_i32 = arith.constant 0 : i32
    %c0_i32_0 = arith.constant 0 : i32
    return %arg0, %c0_i32 : i32, i32
  }
  func.func @transform_1(%arg0: i32) -> (i32, i32) {
    %c0_i32 = arith.constant 0 : i32
    %c0_i32_0 = arith.constant 0 : i32
    %c0_i32_1 = arith.constant 0 : i32
    return %c0_i32, %c0_i32_0 : i32, i32
  }
  func.func @transform_2(%arg0: i32) -> (i32, i32) {
    %c0_i32 = arith.constant 0 : i32
    %c0_i32_0 = arith.constant 0 : i32
    %c0_i32_1 = arith.constant 0 : i32
    return %c0_i32, %c0_i32_0 : i32, i32
  }
  func.func @transform_3(%arg0: i32) -> (i32, i32) {
    %c0_i32 = arith.constant 0 : i32
    %c0_i32_0 = arith.constant 0 : i32
    return %arg0, %c0_i32 : i32, i32
  }
}

</mosaic_0001>

<bundles_post_ra>
// kernel: tpu_custom_call.1
= control target key start
LH: loop header
LB: loop body
LE: loop exit
PB: predicated region body
PF: predicated region fallthrough
CT: control target
= control target key end

     0   :  { %8 = vsyncpa [#allocation3], 0  ;;  %s1007_s0 = inlined_call_operand.hbm [shape: f32[128,256], index: 0, kind: input, shape index: {}]   ;;  %s1008_s1 = inlined_call_operand.hbm [shape: f32[256,128], index: 1, kind: input, shape index: {}]   ;;  %s1009_s2 = inlined_call_operand.vmem [shape: f32[1,128], index: 2, kind: input, shape index: {}]   ;;  %s1010_s3 = inlined_call_operand.hbm [shape: f32[128,128], index: 3, kind: output, shape index: {}]  }
   0x1   :  { %10 = vsyncpa [#allocation3 + $0x1], 0 }
   0x2   :  { %11 = vsyncpa [#allocation6], 0 }
   0x3   :  { %12 = vsyncpa [#allocation4], 0 }
   0x4   :  { %14 = vsyncpa [#allocation4 + $0x1], 0  ;;  %s797_s12 = smov 0   ;;  %s799_s13 = smov 0  }
   0x5   :  { %s801_s14 = smov 0   ;;  %s803_s15 = smov 0  }
   0x6 LB: > { %s818_s16 = sadd.s32 4294967295, %s766_s15   ;;  %s472_s17 = sadd.s32 4294967294, %s766_s15   ;;  %s766_s15 = sphi %s803_s15, %s1032_s15   ;;  %s762_s14 = sphi %s801_s14, %s1031_s14   ;;  %s758_s13 = sphi %s799_s13, %s1030_s13   ;;  %s754_s12 = sphi %s797_s12, %s1029_s12  }
   0x7   : > { %p40_p0 = scmp.ne.s32.totalorder %s758_s13, %s754_s12  ;;  %p1011_p1 = scmp.eq.s32.totalorder %s818_s16, 0 }
   0x8   : > { %p112_p3 = scmp.eq.s32.totalorder %s472_s17, 1  ;;  %p473_p5 = scmp.ge.s32.totalorder %s766_s15, 1 }
   0x9   : > { %p827_p4 = por %p1011_p1, %p40_p0  ;;  %p119_p7 = scmp.lt.s32.totalorder %s766_s15, 3 }
   0xa   : > { %p832_p6 = por %p112_p3, %p40_p0  ;;  %s768_s21 = smov [#allocation5]  }
   0xb   : > { %s1015_s18 = scalar_select %p827_p4, 1, 0 }
   0xc   : > { %s1016_s19 = scalar_select %p832_p6, 1, 0 }
   0xd   : > { %p837_p8 = pnand %p473_p5, %p119_p7  ;;  %s131_s22 = sshll.u32 %s768_s21, 4  ;;  %s132_s22 = int_to_ptr.vmem [resolvable:$true] %s131_s22 }
   0xe   : > { %s851_s24 = sadd.s32 1, %s766_s15   ;;  %s27_s25 = sadd.s32 1, %s762_s14 }
   0xf   : > { %s1017_s20 = scalar_select %p837_p8, 1, 0 }
  0x10   : > { %p589_p9 = pneg %p837_p8  ;;  %s24_s26 = ssub.s32 %s766_s15, %s851_s24 }
  0x11   : > { %s655_s27 = scalar_lea.vmem %s132_s22, 4096  ;;  %p663_p5 = scmp.lt.s32.totalorder %s132_s22, %s132_s22 }
  0x12   : > { %p846_p11 = pnand %p589_p9, %p1011_p1  ;;  %p656_p13 = scmp.ne.s32.totalorder %s132_s22, %s655_s27 }
  0x13   : > { %p664_p7 = scmp.lt.s32.totalorder %s655_s27, %s655_s27 }
  0x14   : > { %p646_p12 = pneg %p846_p11 }
  0x15   : > { %p665_p10 = por %p664_p7, %p663_p5 }
  0x16   : > { %p658_p0 = pnand %p656_p13, %p646_p12 }
  0x18   : > { %p659_p3 = pneg %p658_p0 }
  0x1a   : > { %p666_p2 = pnand %p665_p10, %p659_p3 }
  0x1c   : > { %669 = shalt.err (!%p666_p2)
}
  0x1d   : > { %s769_s28 = smov 128   ;;  %s770_s29 = smov 8  }
  0x1e   : > { %592 = dma.hbm_to_vmem [thread:$0]  (!%p846_p11), %s1008_s1, 4096, %s132_s22, [#allocation6], %s769_s28, %s769_s28, %s770_s29  }
  0x1f   : > { %p25_p9 = scmp.eq.s32.totalorder %s24_s26, 0  ;;  %p34_p12 = scmp.ne.s32.totalorder %s762_s14, %s758_s13 }
  0x20   : > { %p35_p10 = scmp.eq.s32.totalorder %s766_s15, 0  ;;  %p602_p2 = scmp.lt.s32.totalorder %s766_s15, 2 }
  0x21   : > { %s868_s5 = scalar_select %p25_p9, %s762_s14, %s27_s25  }
  0x22   : > { %p36_p13 = por %p35_p10, %p34_p12  ;;  %p1019_p0 = scmp.eq.s32.totalorder %s818_s16, 1 }
  0x23   : > { %s148_s7 = sand.u32 1, %s762_s14   ;;  %s491_s8 = sshll.u32 %s766_s15, 11 }
  0x24   : > { %p872_p3 = por %p1019_p0, %p34_p12  ;;  %s476_s9 = sshll.u32 %s148_s7, 7 }
  0x25   : > { %s881_s17 = scalar_lea.hbm %s1007_s0, %s491_s8  ;;  %s152_s21 = scalar_lea.vmem [#allocation2], %s476_s9 }
  0x26   : > { %s1020_s6 = scalar_select %p872_p3, 1, 0 }
  0x27   : > { %s160_s22 = sshll.u32 %s152_s21, 4  ;;  %p883_p11 = pnand %p602_p2, %p36_p13  ;;  %s887_s22 = int_to_ptr.vmem [resolvable:$true] %s160_s22 }
  0x28   : > { %s889_s25 = scalar_lea.sflag [#allocation3], %s148_s7  ;;  %s670_s26 = scalar_lea.hbm %s881_s17, 2048 }
  0x29   : > { %p671_p5 = scmp.ne.s32.totalorder %s881_s17, %s670_s26  ;;  %p672_p7 = pneg %p883_p11 }
  0x2a   : > { %s675_s29 = scalar_lea.hbm %s1007_s0, 4096  ;;  %p676_p10 = scmp.lt.s32.totalorder %s881_s17, %s1007_s0 }
  0x2b   : > { %p673_p9 = pnand %p672_p7, %p671_p5  ;;  %p677_p2 = scmp.lt.s32.totalorder %s675_s29, %s670_s26 }
  0x2d   : > { %p674_p12 = pneg %p673_p9  ;;  %p678_p13 = por %p677_p2, %p676_p10 }
  0x2f   : > { %p679_p0 = pnand %p678_p13, %p674_p12 }
  0x31   : > { %682 = shalt.err (!%p679_p0)
}
  0x32   : > { %s683_s7 = scalar_lea.vmem %s887_s22, 2048  ;;  %s771_s8 = smov [#allocation2]  }
  0x33   : > { %p684_p1 = scmp.ne.s32.totalorder %s887_s22, %s683_s7  ;;  %s688_s9 = sshll.u32 %s771_s8, 4  ;;  %s689_s9 = int_to_ptr.vmem [resolvable:$false] %s688_s9 }
  0x34   : > { %s690_s10 = scalar_lea.vmem %s689_s9, 4096  ;;  %p691_p9 = scmp.lt.s32.totalorder %s887_s22, %s689_s9 }
  0x35   : > { %p686_p6 = pnand %p684_p1, %p672_p7  ;;  %p692_p3 = scmp.lt.s32.totalorder %s690_s10, %s683_s7 }
  0x37   : > { %p687_p5 = pneg %p686_p6  ;;  %p693_p4 = por %p692_p3, %p691_p9 }
  0x39   : > { %p694_p8 = pnand %p693_p4, %p687_p5 }
  0x3b   : > { %697 = shalt.err (!%p694_p8)
}
  0x3c   : > { %s772_s11 = smov 256   ;;  %s773_s21 = smov 16  }
  0x3d   : > { %596 = dma.hbm_to_vmem [thread:$0]  (!%p883_p11), %s881_s17, 2048, %s887_s22, %s889_s25, %s772_s11, %s772_s11, %s773_s21  }
  0x3e   : > { %p1022_p1 = scmp.ne.s32.totalorder %s1017_s20, 0 }
  0x3f   : > { %s913_s26 = sand.u32 (!%p1022_p1), 1, %s758_s13   ;;  %p1023_p4 = scmp.ne.s32.totalorder (!%p1022_p1), %s1015_s18, 0 }
  0x40   : > { %172 = sbr.rel (%p1022_p1) target bundleno = 332 (0x14c), region = 32  ;;  %s481_s27 = sshll.u32 (!%p1022_p1), %s913_s26, 7 }
  0x41   : > { %s175_s28 = scalar_lea.sflag (!%p1022_p1), [#allocation3], %s913_s26  ;;  %s917_s29 = scalar_lea.vmem (!%p1022_p1), [#allocation2], %s481_s27 }
  0x45   : > { %741 = dma.done.wait (%p1023_p4), %s175_s28, 2048  }
  0x46   : > { %743 = vsyncadd (%p1023_p4), %s175_s28, 4294965248  ;;  %p1024_p6 = scmp.eq.s32.totalorder %s818_s16, 0 }
  0x48   : > { %745 = dma.done.wait (%p1024_p6), [#allocation6], 4096   ;;  %p1025_p8 = pmov %p1024_p6 }
  0x49   : > { %v254_v0 = vld [vmem:[#allocation5 + $0xf8] sm:$0xff]  ;;  %v253_v2 = vld [vmem:[#allocation5 + $0xf0] sm:$0xff]  ;;  %v252_v4 = vld [vmem:[#allocation5 + $0xe8] sm:$0xff]  ;;  %s483_s18 = sshll.u32 %s913_s26, 6  ;;  %s492_s25 = sshll.u32 %s818_s16, 10 }
  0x4a   : > { %747 = vsyncadd (%p1025_p8), [#allocation6], 4294963200  ;;  %v238_v1 = vld [vmem:[#allocation5 + $0x78] sm:$0xff]  ;;  %493 = vmatprep.subr.mxu0 %v254_v0  ;;  %549 = vmatprep.subr.mxu1 %v254_v0  ;;  %v237_v3 = vld [vmem:[#allocation5 + $0x70] sm:$0xff]  ;;  %s947_s22 = scalar_lea.vmem [#allocation7], %s483_s18  ;;  %s962_s7 = scalar_lea.hbm %s1010_s3, %s492_s25 }
  0x4b   : > { %494 = vmatpush3.msra.mxu0 %v238_v1  ;;  %565 = vmatpush3.msra.mxu1 %v238_v1  ;;  %v236_v5 = vld [vmem:[#allocation5 + $0x68] sm:$0xff]  ;;  %v251_v6 = vld [vmem:[#allocation5 + $0xe0] sm:$0xff]  ;;  %v250_v8 = vld [vmem:[#allocation5 + $0xd8] sm:$0xff]  ;;  %s389_s23 = sshll.u32 %s947_s22, 4  ;;  %s376_s16 = scalar_lea.sflag [#allocation4], %s913_s26  ;;  %s955_s23 = int_to_ptr.vmem [resolvable:$true] %s389_s23 }
  0x4c   : > { %495 = vmatprep.subr.mxu0 %v253_v2  ;;  %550 = vmatprep.subr.mxu1 %v253_v2  ;;  %v235_v7 = vld [vmem:[#allocation5 + $0x60] sm:$0xff]  ;;  %v234_v9 = vld [vmem:[#allocation5 + $0x58] sm:$0xff]  ;;  %v249_v10 = vld [vmem:[#allocation5 + $0xd0] sm:$0xff]  ;;  %s698_s8 = scalar_lea.vmem %s955_s23, 1024  ;;  %p1026_p11 = scmp.ne.s32.totalorder %s1020_s6, 0 }
  0x4d   : > { %496 = vmatpush3.msra.mxu0 %v237_v3  ;;  %566 = vmatpush3.msra.mxu1 %v237_v3  ;;  %v233_v11 = vld [vmem:[#allocation5 + $0x50] sm:$0xff]  ;;  %v248_v12 = vld [vmem:[#allocation5 + $0xc8] sm:$0xff]  ;;  %v247_v14 = vld [vmem:[#allocation5 + $0xc0] sm:$0xff]  ;;  %p699_p3 = scmp.ne.s32.totalorder %s955_s23, %s698_s8  ;;  %s774_s9 = smov [#allocation7]  }
  0x4e   : > { %497 = vmatprep.subr.mxu0 %v252_v4  ;;  %551 = vmatprep.subr.mxu1 %v252_v4  ;;  %v232_v13 = vld [vmem:[#allocation5 + $0x48] sm:$0xff]  ;;  %v231_v15 = vld [vmem:[#allocation5 + $0x40] sm:$0xff]  ;;  %v246_v16 = vld [vmem:[#allocation5 + $0xb8] sm:$0xff]  ;;  %s702_s10 = sshll.u32 %s774_s9, 4  ;;  %s703_s10 = int_to_ptr.vmem [resolvable:$false] %s702_s10 }
  0x4f   : > { %498 = vmatpush3.msra.mxu0 %v236_v5  ;;  %567 = vmatpush3.msra.mxu1 %v236_v5  ;;  %v230_v17 = vld [vmem:[#allocation5 + $0x38] sm:$0xff]  ;;  %v245_v18 = vld [vmem:[#allocation5 + $0xb0] sm:$0xff]  ;;  %v244_v20 = vld [vmem:[#allocation5 + $0xa8] sm:$0xff]  ;;  %p700_p7 = pnand %p699_p3, %p1026_p11  ;;  %s704_s11 = scalar_lea.vmem %s703_s10, 2048 }
  0x50   : > { %499 = vmatprep.subr.mxu0 %v251_v6  ;;  %552 = vmatprep.subr.mxu1 %v251_v6  ;;  %v229_v19 = vld [vmem:[#allocation5 + $0x30] sm:$0xff]  ;;  %v228_v21 = vld [vmem:[#allocation5 + $0x28] sm:$0xff]  ;;  %v243_v22 = vld [vmem:[#allocation5 + $0xa0] sm:$0xff]  ;;  %p705_p10 = scmp.lt.s32.totalorder %s955_s23, %s703_s10  ;;  %p706_p2 = scmp.lt.s32.totalorder %s704_s11, %s698_s8 }
  0x51   : > { %500 = vmatpush3.msra.mxu0 %v235_v7  ;;  %568 = vmatpush3.msra.mxu1 %v235_v7  ;;  %v227_v23 = vld [vmem:[#allocation5 + $0x20] sm:$0xff]  ;;  %v242_v24 = vld [vmem:[#allocation5 + $0x98] sm:$0xff]  ;;  %v241_v26 = vld [vmem:[#allocation5 + $0x90] sm:$0xff]  ;;  %p701_p12 = pneg %p700_p7 }
  0x52   : > { %501 = vmatprep.subr.mxu0 %v250_v8  ;;  %553 = vmatprep.subr.mxu1 %v250_v8  ;;  %v226_v25 = vld [vmem:[#allocation5 + $0x18] sm:$0xff]  ;;  %v225_v27 = vld [vmem:[#allocation5 + $0x10] sm:$0xff]  ;;  %v240_v28 = vld [vmem:[#allocation5 + $0x88] sm:$0xff]  ;;  %p707_p13 = por %p706_p2, %p705_p10 }
  0x53   : > { %502 = vmatpush3.msra.mxu0 %v234_v9  ;;  %569 = vmatpush3.msra.mxu1 %v234_v9  ;;  %v224_v29 = vld [vmem:[#allocation5 + $0x8] sm:$0xff]  ;;  %v239_v30 = vld [vmem:[#allocation5 + $0x80] sm:$0xff]  ;;  %v210_v36 = vld [vmem:[%s917_s29 + $0x18] sm:$0xff] }
  0x54   : > { %503 = vmatprep.subr.mxu0 %v249_v10  ;;  %554 = vmatprep.subr.mxu1 %v249_v10  ;;  %v223_v31 = vld [vmem:[#allocation5] sm:$0xff]  ;;  %v208_v32 = vld [vmem:[%s917_s29 + $0x8] sm:$0xff]  ;;  %v218_v37 = vld [vmem:[%s917_s29 + $0x58] sm:$0xff]  ;;  %p708_p0 = pnand %p707_p13, %p701_p12 }
  0x55   : > { %504 = vmatpush3.msra.mxu0 %v233_v11  ;;  %570 = vmatpush3.msra.mxu1 %v233_v11  ;;  %v216_v33 = vld [vmem:[%s917_s29 + $0x48] sm:$0xff]  ;;  %v207_v34 = vld [vmem:[%s917_s29] sm:$0xff]  ;;  %v209_v38 = vld [vmem:[%s917_s29 + $0x10] sm:$0xff] }
  0x56   : > { %505 = vmatprep.subr.mxu0 %v248_v12  ;;  %555 = vmatprep.subr.mxu1 %v248_v12  ;;  %v215_v35 = vld [vmem:[%s917_s29 + $0x40] sm:$0xff]  ;;  %v217_v39 = vld [vmem:[%s917_s29 + $0x50] sm:$0xff]  ;;  %v212_v40 = vld [vmem:[%s917_s29 + $0x28] sm:$0xff] }
  0x57   : > { %506 = vmatpush3.msra.mxu0 %v232_v13  ;;  %571 = vmatpush3.msra.mxu1 %v232_v13  ;;  %v220_v41 = vld [vmem:[%s917_s29 + $0x68] sm:$0xff]  ;;  %v211_v42 = vld [vmem:[%s917_s29 + $0x20] sm:$0xff]  ;;  %v214_v44 = vld [vmem:[%s917_s29 + $0x38] sm:$0xff] }
  0x58   : > { %507 = vmatprep.subr.mxu0 %v247_v14  ;;  %556 = vmatprep.subr.mxu1 %v247_v14  ;;  %v219_v43 = vld [vmem:[%s917_s29 + $0x60] sm:$0xff]  ;;  %v222_v45 = vld [vmem:[%s917_s29 + $0x78] sm:$0xff]  ;;  %v213_v46 = vld [vmem:[%s917_s29 + $0x30] sm:$0xff] }
  0x59   : > { %508 = vmatpush3.msra.mxu0 %v231_v15  ;;  %572 = vmatpush3.msra.mxu1 %v231_v15  ;;  %v221_v47 = vld [vmem:[%s917_s29 + $0x70] sm:$0xff]  ;;  %v484_v50 = vld [vmem:[%s1009_s2] ss:$0 sm:$0xff] }
  0x5a   : > { %509 = vmatprep.subr.mxu0 %v246_v16  ;;  %557 = vmatprep.subr.mxu1 %v246_v16 }
  0x5b   : > { %510 = vmatpush3.msra.mxu0 %v230_v17  ;;  %573 = vmatpush3.msra.mxu1 %v230_v17 }
  0x5c   : > { %511 = vmatprep.subr.mxu0 %v245_v18  ;;  %558 = vmatprep.subr.mxu1 %v245_v18 }
  0x5d   : > { %512 = vmatpush3.msra.mxu0 %v229_v19  ;;  %574 = vmatpush3.msra.mxu1 %v229_v19 }
  0x5e   : > { %513 = vmatprep.subr.mxu0 %v244_v20  ;;  %559 = vmatprep.subr.mxu1 %v244_v20 }
  0x5f   : > { %514 = vmatpush3.msra.mxu0 %v228_v21  ;;  %575 = vmatpush3.msra.mxu1 %v228_v21 }
  0x60   : > { %515 = vmatprep.subr.mxu0 %v243_v22  ;;  %560 = vmatprep.subr.mxu1 %v243_v22 }
  0x61   : > { %516 = vmatpush3.msra.mxu0 %v227_v23  ;;  %576 = vmatpush3.msra.mxu1 %v227_v23 }
  0x62   : > { %517 = vmatprep.subr.mxu0 %v242_v24  ;;  %561 = vmatprep.subr.mxu1 %v242_v24 }
  0x63   : > { %518 = vmatpush3.msra.mxu0 %v226_v25  ;;  %577 = vmatpush3.msra.mxu1 %v226_v25 }
  0x64   : > { %519 = vmatprep.subr.mxu0 %v241_v26  ;;  %562 = vmatprep.subr.mxu1 %v241_v26 }
  0x65   : > { %520 = vmatpush3.msra.mxu0 %v225_v27  ;;  %578 = vmatpush3.msra.mxu1 %v225_v27 }
  0x66   : > { %521 = vmatprep.subr.mxu0 %v240_v28  ;;  %563 = vmatprep.subr.mxu1 %v240_v28 }
  0x67   : > { %522 = vmatpush3.msra.mxu0 %v224_v29  ;;  %579 = vmatpush3.msra.mxu1 %v224_v29 }
  0x68   : > { %523 = vmatprep.subr.mxu0 %v239_v30  ;;  %564 = vmatprep.subr.mxu1 %v239_v30 }
  0x69   : > { %524 = vmatpush3.msra.mxu0 %v223_v31  ;;  %580 = vmatpush3.msra.mxu1 %v223_v31 }
  0x6a   : > { %326 = vmatprep.mubr.f32.mxu0 %v208_v32  ;;  %346 = vmatprep.mubr.f32.mxu1 %v216_v33 }
  0x6b   : > { %327 = vmatmul.mubr.f32.vlgmr.msra.gmra.mxu0 %v207_v34  ;;  %347 = vmatmul.mubr.f32.vlgmr.msra.gmra.mxu1 %v215_v35 }
  0x6c   : > { %331 = vmatprep.mubr.f32.mxu0 %v210_v36  ;;  %351 = vmatprep.mubr.f32.mxu1 %v218_v37 }
  0x6f   : > { %332 = vmatmul.mubr.f32.gmra.mxu0 %v209_v38  ;;  %352 = vmatmul.mubr.f32.gmra.mxu1 %v217_v39 }
  0x70   : > { %336 = vmatprep.mubr.f32.mxu0 %v212_v40  ;;  %356 = vmatprep.mubr.f32.mxu1 %v220_v41 }
  0x73   : > { %337 = vmatmul.mubr.f32.gmra.mxu0 %v211_v42  ;;  %357 = vmatmul.mubr.f32.gmra.mxu1 %v219_v43 }
  0x74   : > { %341 = vmatprep.mubr.f32.mxu0 %v214_v44  ;;  %361 = vmatprep.mubr.f32.mxu1 %v222_v45 }
  0x77   : > { %342 = vmatmul.mubr.f32.gmra.mxu0 %v213_v46  ;;  %362 = vmatmul.mubr.f32.gmra.mxu1 %v221_v47 }
 0x12b   : > { %v525_v48 = vpop.f32.mrf.mxu0  ;;  %v537_v49 = vpop.f32.mrf.mxu1 }
 0x12d   : > { %v526_v51 = vpop.f32.mrf.mxu0  ;;  %v538_v52 = vpop.f32.mrf.mxu1 }
 0x12e   : > { %v527_v53 = vadd.f32 %v526_v51, %v525_v48  ;;  %v539_v54 = vadd.f32 %v538_v52, %v537_v49 }
 0x12f   : > { %v528_v55 = vpop.f32.mrf.mxu0  ;;  %v540_v56 = vpop.f32.mrf.mxu1 }
 0x130   : > { %v329_v57 = vadd.f32 %v527_v53, %v484_v50  ;;  %v349_v58 = vadd.f32 %v539_v54, %v484_v50 }
 0x131   : > { %v529_v59 = vpop.f32.mrf.mxu0  ;;  %v541_v60 = vpop.f32.mrf.mxu1 }
 0x132   : > { %367 = vst [vmem:[%s947_s22] sm:$0xff] %v329_v57  ;;  %371 = vst [vmem:[%s947_s22 + $0x20] sm:$0xff] %v349_v58  ;;  %v530_v61 = vadd.f32 %v529_v59, %v528_v55  ;;  %v542_v62 = vadd.f32 %v541_v60, %v540_v56 }
 0x133   : > { %v531_v63 = vpop.f32.mrf.mxu0  ;;  %v543_v0 = vpop.f32.mrf.mxu1 }
 0x134   : > { %v334_v1 = vadd.f32 %v530_v61, %v484_v50  ;;  %v354_v2 = vadd.f32 %v542_v62, %v484_v50 }
 0x135   : > { %v532_v3 = vpop.f32.mrf.mxu0  ;;  %v544_v4 = vpop.f32.mrf.mxu1 }
 0x136   : > { %368 = vst [vmem:[%s947_s22 + $0x8] sm:$0xff] %v334_v1  ;;  %372 = vst [vmem:[%s947_s22 + $0x28] sm:$0xff] %v354_v2  ;;  %v533_v5 = vadd.f32 %v532_v3, %v531_v63  ;;  %v545_v6 = vadd.f32 %v544_v4, %v543_v0 }
 0x137   : > { %v534_v7 = vpop.f32.mrf.mxu0  ;;  %v546_v8 = vpop.f32.mrf.mxu1 }
 0x138   : > { %v339_v9 = vadd.f32 %v533_v5, %v484_v50  ;;  %v359_v10 = vadd.f32 %v545_v6, %v484_v50 }
 0x139   : > { %v535_v11 = vpop.f32.mrf.mxu0  ;;  %v547_v12 = vpop.f32.mrf.mxu1 }
 0x13a   : > { %369 = vst [vmem:[%s947_s22 + $0x10] sm:$0xff] %v339_v9  ;;  %373 = vst [vmem:[%s947_s22 + $0x30] sm:$0xff] %v359_v10  ;;  %v536_v13 = vadd.f32 %v535_v11, %v534_v7  ;;  %v548_v14 = vadd.f32 %v547_v12, %v546_v8 }
 0x13c   : > { %v344_v15 = vadd.f32 %v536_v13, %v484_v50  ;;  %v364_v16 = vadd.f32 %v548_v14, %v484_v50 }
 0x13e   : > { %370 = vst [vmem:[%s947_s22 + $0x18] sm:$0xff] %v344_v15  ;;  %374 = vst [vmem:[%s947_s22 + $0x38] sm:$0xff] %v364_v16 }
 0x13f   : > { %711 = shalt.err (!%p708_p0)
}
 0x140   : > { %s712_s21 = scalar_lea.hbm %s962_s7, 1024  ;;  %s716_s29 = scalar_lea.hbm %s1010_s3, 2048 }
 0x141   : > { %p713_p5 = scmp.ne.s32.totalorder %s962_s7, %s712_s21  ;;  %p717_p4 = scmp.lt.s32.totalorder %s962_s7, %s1010_s3 }
 0x142   : > { %p718_p6 = scmp.lt.s32.totalorder %s716_s29, %s712_s21 }
 0x143   : > { %p714_p9 = pnand %p713_p5, %p1026_p11 }
 0x144   : > { %p719_p8 = por %p718_p6, %p717_p4 }
 0x145   : > { %p715_p1 = pneg %p714_p9 }
 0x147   : > { %p720_p3 = pnand %p719_p8, %p715_p1 }
 0x149   : > { %723 = shalt.err (!%p720_p3)
}
 0x14a   : > { %s775_s17 = smov 128   ;;  %s776_s22 = smov 8  }
 0x14b   : > { %587 = dma.vmem_to_hbm [thread:$0]  (%p1026_p11), %s955_s23, 1024, %s962_s7, %s376_s16, %s775_s17, %s775_s17, %s776_s22  }
 0x14c PF: > { %s404_s25 = sand.u32 1, %s754_s12   ;;  %p1027_p7 = scmp.ne.s32.totalorder %s1016_s19, 0 }
 0x14d   : > { %p1028_p12 = scmp.ge.s32.totalorder %s766_s15, 2  ;;  %s405_s30 = scalar_lea.sflag [#allocation4], %s404_s25 }
 0x14f   : > { %p598_p10 = pnand %p1028_p12, %p1027_p7 }
 0x151   : > { %p599_p2 = pneg %p598_p10 }
 0x153   : > { %749 = dma.done.wait (%p599_p2), %s405_s30, 1024  }
 0x154   : > { %751 = vsyncadd (%p599_p2), %s405_s30, 4294966272  ;;  %p17_p13 = scmp.ge.s32.totalorder %s851_s24, 4   ;;  %s1029_s12 = smov %s758_s13 }
 0x155   : > { %s1030_s13 = smov %s762_s14  ;;  %s1031_s14 = smov %s868_s5 }
 0x156   : > { %s1032_s15 = smov %s851_s24  ;;  %19 = sbr.rel (!%p17_p13) target bundleno = 6 (0x6), region = 81 }
 0x15b   :  { %410 = vsyncpa [#allocation3], 1 }
 0x15c   :  { %412 = vsyncpa [#allocation3 + $0x1], 1 }
 0x15d   :  { %413 = vsyncpa [#allocation6], 1 }
 0x15e   :  { %414 = vsyncpa [#allocation4], 1 }
 0x15f   :  { %416 = vsyncpa [#allocation4 + $0x1], 1 }

</bundles_post_ra>
